<compile_context>
chip_gen: v6e
topology: v6e:2x2x1
jax: 0.10.0
libtpu: 0.0.40
codegen_flags: <defaults>
</compile_context>

<pallas_src>
import functools

import jax
import jax.numpy as jnp
from jax import lax
from jax.experimental import pallas as pl
from jax.experimental.pallas import tpu as pltpu

_MIB = 1024 * 1024


# ---------------------------------------------------------------------------
# Kernels
# ---------------------------------------------------------------------------

def _hinge_tile(x_ref, y_ref, m_ref, *, margin, pad_value, ignore_pad):
    """Per-tile hinge math shared by both kernels.

    Returns (loss_f32 (TB,C), mask_f32 or None, pad_mask (TB,1) or None)."""
    x = x_ref[...].astype(jnp.float32)
    y = y_ref[...].astype(jnp.float32)

    # targets = sum(inputs * labels, dim=1, keepdim=True)  -> (TB, 1)
    targets = jnp.sum(x * y, axis=1, keepdims=True)

    # loss = relu(inputs - targets + margin * (1 - labels))
    loss = jnp.maximum(x - targets + margin * (1.0 - y), 0.0)

    m = None
    if m_ref is not None:
        m = m_ref[...].astype(jnp.float32)   # widen narrow mask in-register
        loss = loss * m

    pad_mask = None
    if ignore_pad:
        # Note: exact-equality pad test is done on the f32-accumulated row sum
        # (matches the f32 reference; may differ from a pure-bf16 accumulation
        # in pathological exact-pad_value cases).
        pad_mask = (targets != pad_value).astype(jnp.float32)  # (TB, 1)
        loss = loss * pad_mask

    return loss, m, pad_mask


def _hinge_none_kernel(*refs, margin, pad_value, ignore_pad, has_mask):
    """reduction='none': writes the elementwise (TB, C) loss only."""
    if has_mask:
        x_ref, y_ref, m_ref, o_ref = refs
    else:
        x_ref, y_ref, o_ref = refs
        m_ref = None
    loss, _, _ = _hinge_tile(x_ref, y_ref, m_ref, margin=margin,
                             pad_value=pad_value, ignore_pad=ignore_pad)
    # Pallas masks write-back of rows past B on the partial last tile.
    o_ref[...] = loss.astype(o_ref.dtype)


def _hinge_stats_kernel(*refs, margin, pad_value, ignore_pad, has_mask,
                        tile_rows, n_rows):
    """reduction='mean'/'sum': writes per-tile [sum(loss), valid count] only."""
    if has_mask:
        x_ref, y_ref, m_ref, stats_ref = refs
    else:
        x_ref, y_ref, stats_ref = refs
        m_ref = None

    loss, m, pad_mask = _hinge_tile(x_ref, y_ref, m_ref, margin=margin,
                                    pad_value=pad_value, ignore_pad=ignore_pad)
    tb, c = loss.shape

    # Denominator: torch's ones_like * mask * pad_mask collapsed to row sums.
    if m is not None:
        row_count = jnp.sum(m, axis=1, keepdims=True)           # (TB, 1)
    else:
        row_count = jnp.full((tb, 1), float(c), jnp.float32)
    if pad_mask is not None:
        row_count = row_count * pad_mask

    # Zero out rows of a partial last tile (reads past B are garbage/NaN).
    row_ids = (lax.broadcasted_iota(jnp.int32, (tb, 1), 0)
               + pl.program_id(0) * tile_rows)
    valid = row_ids < n_rows
    loss = jnp.where(valid, loss, 0.0)
    row_count = jnp.where(valid, row_count, 0.0)

    stats_ref[0, 0] = jnp.sum(loss)
    stats_ref[0, 1] = jnp.sum(row_count)


# ---------------------------------------------------------------------------
# Tile planning
# ---------------------------------------------------------------------------

def _vmem_capacity_bytes():
    try:
        return int(pltpu.get_tpu_info().vmem_capacity_bytes)
    except Exception:
        return 64 * _MIB   # conservative fallback: v7x per-TensorCore VMEM


def _plan_tiles(n_rows, n_cols, in_itemsizes, out_itemsize):
    """Pick the row-tile size and VMEM limit for the streaming grid."""
    cap = _vmem_capacity_bytes()
    all_items = list(in_itemsizes) + ([out_itemsize] if out_itemsize else [])

    # Sub-32-bit dtypes pack along sublanes: keep non-full row tiles aligned
    # (8 for >=4B, 16 for 2B, 32 for 1B element types).
    sub_mult = max(8, 32 // max(1, min(all_items)))

    # Double-buffered bytes per element across every streamed array.
    per_elem_db = 2 * sum(all_items)

    # Budget for the pipelined windows; leave the rest for in-register f32
    # temps and compiler scratch (critical on v7x's 64 MiB VMEM).
    dma_budget = int(0.45 * cap)
    if sub_mult * n_cols * per_elem_db > dma_budget:
        # TODO(synk): column-tile the class axis (two-pass: per-row targets
        # over C tiles, then loss) instead of erroring for extremely large C.
        raise ValueError(
            f"HingeLoss Pallas kernel: class dim C={n_cols} is too large to "
            f"keep un-tiled within {cap // _MIB} MiB of VMEM.")

    # Amortize the ~0.35us/grid-step overhead: ~4 MiB/buffer on 128 MiB parts
    # (v5e/v6e), ~2 MiB on 64 MiB parts (v7x).
    per_buf_target = (4 if cap >= 128 * _MIB else 2) * _MIB
    widest_in = max(in_itemsizes)
    tb_cap = min(per_buf_target // max(1, n_cols * widest_in),
                 dma_budget // max(1, n_cols * per_elem_db))

    if tb_cap >= n_rows:
        if n_rows >= 2 * sub_mult:
            # Guarantee >=2 grid tiles so the "parallel" batch axis can be
            # sharded across v7x's two TensorCores.
            half = (n_rows + 1) // 2
            tb = ((half + sub_mult - 1) // sub_mult) * sub_mult
        else:
            tb = n_rows            # full dim -> trivially satisfies (8,128) rule
    else:
        tb = max(sub_mult, (tb_cap // sub_mult) * sub_mult)

    # Actual double-buffered footprint of this tile choice (counted ONCE) plus
    # headroom; never request more than 75% of physical VMEM.
    db_bytes = tb * n_cols * per_elem_db
    vmem_limit = min(int(0.75 * cap), max(32 * _MIB, db_bytes + 8 * _MIB))
    return tb, int(vmem_limit)


# ---------------------------------------------------------------------------
# Wrapper
# ---------------------------------------------------------------------------

def hinge_loss(inputs, labels, mask=None, *, margin=1.0, reduction="mean",
               ignore_pad=True, pad_value=0.0):
    """JAX/Pallas equivalent of HingeLoss(margin, reduction, ignore_pad, pad_value)."""
    assert inputs.shape == labels.shape
    B, C = inputs.shape
    has_mask = mask is not None

    # Output dtype for 'none' follows the inputs/labels promotion (PyTorch-like).
    out_dtype = jnp.result_type(inputs.dtype, labels.dtype)
    if not jnp.issubdtype(out_dtype, jnp.floating):
        out_dtype = jnp.float32

    if has_mask:
        # Byte diet: masks are (expected) binary -> never stream them wider
        # than the inputs; bool streams as int8. Widened to f32 in-register.
        if mask.dtype == jnp.bool_:
            mask = mask.astype(jnp.int8)
        elif jnp.dtype(mask.dtype).itemsize > jnp.dtype(inputs.dtype).itemsize:
            mask = mask.astype(inputs.dtype)

    args = [inputs, labels] + ([mask] if has_mask else [])
    in_itemsizes = [jnp.dtype(a.dtype).itemsize for a in args]

    if reduction == "none":
        out_itemsize = jnp.dtype(out_dtype).itemsize
    elif reduction in ("mean", "sum"):
        out_itemsize = 0            # stats output is tiny SMEM, ignore in budget
    else:
        raise ValueError(f"unknown reduction: {reduction}")

    tb, vmem_limit = _plan_tiles(B, C, in_itemsizes, out_itemsize)
    n_tiles = pl.cdiv(B, tb)
    in_specs = [pl.BlockSpec((tb, C), lambda i: (i, 0)) for _ in args]

    # Per-tile partials -> no carry across the batch axis; "parallel" lets the
    # runtime shard it across TensorCores.
    # TODO(synk): evaluate pltpu.CORE_PARALLEL on v7x if profiling shows only
    # one TensorCore busy with plain "parallel".
    cparams = pltpu.CompilerParams(
        dimension_semantics=("parallel",),
        vmem_limit_bytes=vmem_limit,
    )

    if reduction == "none":
        kernel = functools.partial(
            _hinge_none_kernel, margin=float(margin),
            pad_value=float(pad_value), ignore_pad=bool(ignore_pad),
            has_mask=has_mask)
        return pl.pallas_call(
            kernel,
            out_shape=jax.ShapeDtypeStruct((B, C), out_dtype),
            grid=(n_tiles,),
            in_specs=in_specs,
            out_specs=pl.BlockSpec((tb, C), lambda i: (i, 0)),
            compiler_params=cparams,
        )(*args)

    kernel = functools.partial(
        _hinge_stats_kernel, margin=float(margin),
        pad_value=float(pad_value), ignore_pad=bool(ignore_pad),
        has_mask=has_mask, tile_rows=tb, n_rows=B)
    stats = pl.pallas_call(
        kernel,
        out_shape=jax.ShapeDtypeStruct((n_tiles, 2), jnp.float32),
        grid=(n_tiles,),
        in_specs=in_specs,
        out_specs=pl.BlockSpec((1, 2), lambda i: (i, 0),
                               memory_space=pltpu.MemorySpace.SMEM),
        compiler_params=cparams,
    )(*args)

    total = jnp.sum(stats[:, 0])
    if reduction == "sum":
        return total
    count = jnp.sum(stats[:, 1])
    return total / (count + 1e-12)


# ---------------------------------------------------------------------------
# Pure-JAX reference (mirrors the PyTorch module) + self-test
# ---------------------------------------------------------------------------

def _reference(inputs, labels, mask=None, *, margin=1.0, reduction="mean",
               ignore_pad=True, pad_value=0.0):
    targets = jnp.sum(inputs * labels, axis=1, keepdims=True)
    loss = jax.nn.relu(inputs - targets + margin * (1.0 - labels))
    if mask is not None:
        loss = loss * mask
    pad_mask = (targets != pad_value).astype(jnp.float32)
    if ignore_pad:
        loss = loss * pad_mask
    if reduction == "none":
        return loss
    if reduction == "sum":
        return jnp.sum(loss)
    ones = jnp.ones_like(inputs)
    if mask is not None:
        ones = ones * mask
    if ignore_pad:
        ones = ones * pad_mask
    return jnp.sum(loss) / (jnp.sum(ones) + 1e-12)


if __name__ == "__main__":
    key = jax.random.PRNGKey(0)
    k1, k2, k3, k4, k5, k6 = jax.random.split(key, 6)

    results = []

    # --- Small single-tile case (exercises ignore_pad on row 0) -------------
    B, C = 8, 128
    inputs = jax.random.normal(k1, (B, C), dtype=jnp.float32)
    inputs = inputs.at[0].set(0.0)          # row 0 -> targets == pad_value
    label_idx = jax.random.randint(k2, (B,), 0, C)
    labels = jax.nn.one_hot(label_idx, C, dtype=jnp.float32)
    mask = (jax.random.uniform(k3, (B, C)) > 0.3).astype(jnp.float32)

    for m in (None, mask):
        for red in ("mean", "sum", "none"):
            out = hinge_loss(inputs, labels, m, margin=1.0, reduction=red)
            ref = _reference(inputs, labels, m, margin=1.0, reduction=red)
            out, ref = jax.block_until_ready((out, ref))
            assert jnp.allclose(out, ref, atol=1e-4, rtol=1e-5), \
                f"mismatch: reduction={red} mask={m is not None}"
            results.append(out)

    # --- Multi-tile case (>=2 grid tiles + partial last tile) ---------------
    B2 = 40
    inputs2 = jax.random.normal(k4, (B2, C), dtype=jnp.float32)
    labels2 = jax.nn.one_hot(jax.random.randint(k5, (B2,), 0, C), C,
                             dtype=jnp.float32)
    mask2 = (jax.random.uniform(k6, (B2, C)) > 0.3).astype(jnp.float32)
    for red in ("mean", "none"):
        out = hinge_loss(inputs2, labels2, mask2, margin=0.5, reduction=red)
        ref = _reference(inputs2, labels2, mask2, margin=0.5, reduction=red)
        out, ref = jax.block_until_ready((out, ref))
        assert jnp.allclose(out, ref, atol=1e-4, rtol=1e-5), \
            f"multi-tile mismatch: reduction={red}"
        results.append(out)

    jax.block_until_ready(results)
    print("KERNEL_OK")
</pallas_src>

<mosaic_0001>
module attributes {stable_mosaic.version = 11 : i64} {
  func.func @_hinge_stats_kernel(%arg0: i32, %arg1: memref<8x128xf32, #tpu.memory_space<vmem>>, %arg2: memref<8x128xf32, #tpu.memory_space<vmem>>, %arg3: memref<1x2xf32, #tpu.memory_space<smem>>) attributes {dimension_semantics = [#tpu.dimension_semantics<parallel>], iteration_bounds = array<i64: 1>, scalar_prefetch = 0 : i64, scratch_operands = 0 : i64, tpu.core_type = #tpu.core_type<tc>, window_params = [{transform_indices = @transform_0, window_bounds = array<i64: 8, 128>}, {transform_indices = @transform_1, window_bounds = array<i64: 8, 128>}, {transform_indices = @transform_2, window_bounds = array<i64: 1, 2>}]} {
    %c0 = arith.constant 0 : index
    %c0_0 = arith.constant 0 : index
    %0 = vector.load %arg1[%c0, %c0_0] : memref<8x128xf32, #tpu.memory_space<vmem>>, vector<8x128xf32>
    %c0_1 = arith.constant 0 : index
    %c0_2 = arith.constant 0 : index
    %1 = vector.load %arg2[%c0_1, %c0_2] : memref<8x128xf32, #tpu.memory_space<vmem>>, vector<8x128xf32>
    %2 = arith.mulf %0, %1 : vector<8x128xf32>
    %cst = arith.constant dense<0.000000e+00> : vector<8xf32>
    %3 = vector.multi_reduction <add>, %2, %cst [1] : vector<8x128xf32> to vector<8xf32>
    %4 = vector.shape_cast %3 : vector<8xf32> to vector<8x1xf32>
    %5 = vector.broadcast %4 : vector<8x1xf32> to vector<8x128xf32>
    %6 = arith.subf %0, %5 : vector<8x128xf32>
    %cst_3 = arith.constant 1.000000e+00 : f32
    %7 = vector.broadcast %cst_3 : f32 to vector<8x128xf32>
    %8 = arith.subf %7, %1 : vector<8x128xf32>
    %cst_4 = arith.constant 1.000000e+00 : f32
    %9 = vector.broadcast %cst_4 : f32 to vector<8x128xf32>
    %10 = arith.mulf %9, %8 : vector<8x128xf32>
    %11 = arith.addf %6, %10 : vector<8x128xf32>
    %cst_5 = arith.constant 0.000000e+00 : f32
    %12 = vector.broadcast %cst_5 : f32 to vector<8x128xf32>
    %13 = arith.maximumf %11, %12 : vector<8x128xf32>
    %cst_6 = arith.constant 0.000000e+00 : f32
    %14 = vector.broadcast %cst_6 : f32 to vector<8x1xf32>
    %15 = arith.cmpf one, %4, %14 : vector<8x1xf32>
    %16 = arith.extui %15 : vector<8x1xi1> to vector<8x1xi32>
    %17 = arith.sitofp %16 : vector<8x1xi32> to vector<8x1xf32>
    %18 = vector.broadcast %17 : vector<8x1xf32> to vector<8x128xf32>
    %19 = arith.mulf %13, %18 : vector<8x128xf32>
    %cst_7 = arith.constant 1.280000e+02 : f32
    %20 = vector.broadcast %cst_7 : f32 to vector<8x1xf32>
    %21 = arith.mulf %20, %17 : vector<8x1xf32>
    %22 = tpu.iota {dimensions = array<i32: 0>} : vector<8x1xi32>
    %c8_i32 = arith.constant 8 : i32
    %23 = arith.muli %arg0, %c8_i32 : i32
    %24 = vector.broadcast %23 : i32 to vector<8x1xi32>
    %25 = arith.addi %22, %24 : vector<8x1xi32>
    %c8_i32_8 = arith.constant 8 : i32
    %26 = vector.broadcast %c8_i32_8 : i32 to vector<8x1xi32>
    %27 = arith.cmpi slt, %25, %26 : vector<8x1xi32>
    %cst_9 = arith.constant 0.000000e+00 : f32
    %28 = vector.shape_cast %27 : vector<8x1xi1> to vector<8x1xi1>
    %29 = vector.broadcast %28 : vector<8x1xi1> to vector<8x128xi1>
    %30 = vector.broadcast %cst_9 : f32 to vector<8x128xf32>
    %31 = arith.select %29, %19, %30 : vector<8x128xi1>, vector<8x128xf32>
    %cst_10 = arith.constant 0.000000e+00 : f32
    %32 = vector.broadcast %cst_10 : f32 to vector<8x1xf32>
    %33 = arith.select %27, %21, %32 : vector<8x1xi1>, vector<8x1xf32>
    %34 = vector.shape_cast %31 : vector<8x128xf32> to vector<1x8x128xf32>
    %cst_11 = arith.constant dense<0.000000e+00> : vector<1xf32>
    %35 = vector.multi_reduction <add>, %34, %cst_11 [1, 2] : vector<1x8x128xf32> to vector<1xf32>
    %36 = vector.shape_cast %35 : vector<1xf32> to vector<1x1x1xf32>
    %37 = vector.extract %36[0, 0, 0] : f32 from vector<1x1x1xf32>
    %c0_12 = arith.constant 0 : index
    %c0_13 = arith.constant 0 : index
    %38 = memref.load %arg3[%c0_12, %c0_13] : memref<1x2xf32, #tpu.memory_space<smem>>
    memref.store %37, %arg3[%c0_12, %c0_13] : memref<1x2xf32, #tpu.memory_space<smem>>
    %39 = vector.shape_cast %33 : vector<8x1xf32> to vector<1x8x1xf32>
    %cst_14 = arith.constant dense<0.000000e+00> : vector<1xf32>
    %40 = vector.multi_reduction <add>, %39, %cst_14 [1, 2] : vector<1x8x1xf32> to vector<1xf32>
    %41 = vector.shape_cast %40 : vector<1xf32> to vector<1x1x1xf32>
    %42 = vector.extract %41[0, 0, 0] : f32 from vector<1x1x1xf32>
    %c0_15 = arith.constant 0 : index
    %c1 = arith.constant 1 : index
    %43 = memref.load %arg3[%c0_15, %c1] : memref<1x2xf32, #tpu.memory_space<smem>>
    memref.store %42, %arg3[%c0_15, %c1] : memref<1x2xf32, #tpu.memory_space<smem>>
    return
  }
  func.func @transform_0(%arg0: i32) -> (i32, i32) {
    %c0_i32 = arith.constant 0 : i32
    %c0_i32_0 = arith.constant 0 : i32
    return %arg0, %c0_i32 : i32, i32
  }
  func.func @transform_1(%arg0: i32) -> (i32, i32) {
    %c0_i32 = arith.constant 0 : i32
    %c0_i32_0 = arith.constant 0 : i32
    return %arg0, %c0_i32 : i32, i32
  }
  func.func @transform_2(%arg0: i32) -> (i32, i32) {
    %c0_i32 = arith.constant 0 : i32
    %c0_i32_0 = arith.constant 0 : i32
    return %arg0, %c0_i32 : i32, i32
  }
}

</mosaic_0001>

<bundles_post_ra>
// kernel: tpu_custom_call.1
= control target key start
LH: loop header
LB: loop body
LE: loop exit
PB: predicated region body
PF: predicated region fallthrough
CT: control target
= control target key end

     0   :  { %7 = vsyncpa [#allocation3], 0  ;;  %s190_s0 = inlined_call_operand.hbm [shape: f32[8,128], index: 0, kind: input, shape index: {}]   ;;  %s191_s1 = inlined_call_operand.hbm [shape: f32[8,128], index: 1, kind: input, shape index: {}]   ;;  %s192_s2 = inlined_call_operand.hbm [shape: f32[1,2], index: 2, kind: output, shape index: {}]  }
   0x1   :  { %8 = vsyncpa [#allocation6], 0 }
   0x2   :  { %9 = vsyncpa [#allocation4], 0  ;;  %s162_s9 = smov [#allocation2]   ;;  %s163_s11 = smov [#allocation5]  }
   0x3   :  { %s16_s10 = sshll.u32 %s162_s9, 4  ;;  %s26_s12 = sshll.u32 %s163_s11, 4  ;;  %s17_s10 = int_to_ptr.vmem [resolvable:$true] %s16_s10  ;;  %s27_s12 = int_to_ptr.vmem [resolvable:$true] %s26_s12 }
   0x4   :  { %s116_s13 = scalar_lea.vmem %s17_s10, 128  ;;  %p121_p1 = scmp.lt.s32.totalorder %s17_s10, %s17_s10 }
   0x5   :  { %p117_p0 = scmp.ne.s32.totalorder %s17_s10, %s116_s13  ;;  %p122_p2 = scmp.lt.s32.totalorder %s116_s13, %s116_s13 }
   0x7   :  { %p123_p3 = por %p122_p2, %p121_p1 }
   0x9   :  { %p124_p4 = pnand %p123_p3, %p117_p0 }
   0xb   :  { %127 = shalt.err (!%p124_p4)
}
   0xc   :  { %19 = dma.hbm_to_vmem [thread:$0]  %s190_s0, 128, %s17_s10, [#allocation3]  }
   0xd   :  { %s136_s16 = scalar_lea.vmem %s27_s12, 128  ;;  %p141_p6 = scmp.lt.s32.totalorder %s27_s12, %s27_s12 }
   0xe   :  { %p137_p5 = scmp.ne.s32.totalorder %s27_s12, %s136_s16  ;;  %p142_p7 = scmp.lt.s32.totalorder %s136_s16, %s136_s16 }
  0x10   :  { %p143_p8 = por %p142_p7, %p141_p6 }
  0x12   :  { %p144_p9 = pnand %p143_p8, %p137_p5 }
  0x14   :  { %147 = shalt.err (!%p144_p9)
}
  0x15   :  { %29 = dma.hbm_to_vmem [thread:$0]  %s191_s1, 128, %s27_s12, [#allocation6]  }
  0x16   :  { %156 = dma.done.wait [#allocation3], 128  }
  0x17   :  { %157 = vsyncadd [#allocation3], 4294967168 }
  0x18   :  { %158 = dma.done.wait [#allocation6], 128  }
  0x19   :  { %159 = vsyncadd [#allocation6], 4294967168  ;;  %v36_v0 = vld [vmem:[#allocation2] sm:$0xff]  ;;  %v37_v1 = vld [vmem:[#allocation5] sm:$0xff]  ;;  %v164_v6 = vmov 0.0   ;;  %vm71_vm1 = vcmask 7168  }
  0x1a   :  { %v38_v2 = vmul.f32 %v37_v1, %v36_v0  ;;  %v42_v3 = vsub.f32 1.0, %v37_v1  ;;  %s165_s19 = smov [#allocation7]  }
  0x1c   :  { %39 = vadd.xlane.f32.xlu0 %v38_v2 }
  0xa5   :  { %v40_v4 = vpop.xlane.xlu0 %39 }
  0xa6   :  { %v41_v5 = vsub.f32 %v36_v0, %v40_v4  ;;  %vm45_vm0 = vcmp.ne.f32.partialorder %v40_v4, 0.0 }
  0xa7   :  { %v99_v7 = vsel %vm45_vm0, 1.0, %v164_v6 }
  0xa8   :  { %v43_v8 = vadd.f32 %v42_v3, %v41_v5  ;;  %v49_v9 = vmul.f32 128.0, %v99_v7 }
  0xaa   :  { %v72_v10 = vsel %vm71_vm1, %v49_v9, 0.0  ;;  %v44_v11 = vmax.f32 %v43_v8, 0.0 }
  0xab   :  { %73 = vadd.xlane.f32.xlu1 %v72_v10 }
  0xac   :  { %v48_v12 = vmul.f32 %v99_v7, %v44_v11 }
  0xae   :  { %60 = vadd.xlane.f32.xlu0 %v48_v12 }
 0x134   :  { %v74_v13 = vpop.xlane.xlu1 %73 }
 0x135   :  { %v75_v14 = vrot.slane %v74_v13, 4 }
 0x137   :  { %v76_v15 = vadd.f32 %v75_v14, %v74_v13  ;;  %v61_v16 = vpop.xlane.xlu0 %60 }
 0x138   :  { %v62_v17 = vrot.slane %v61_v16, 4 }
 0x139   :  { %v77_v18 = vrot.slane %v76_v15, 2 }
 0x13a   :  { %v63_v19 = vadd.f32 %v62_v17, %v61_v16 }
 0x13b   :  { %v78_v20 = vadd.f32 %v77_v18, %v76_v15 }
 0x13c   :  { %v64_v21 = vrot.slane %v63_v19, 2 }
 0x13d   :  { %v79_v23 = vrot.slane %v78_v20, 1 }
 0x13e   :  { %v65_v22 = vadd.f32 %v64_v21, %v63_v19 }
 0x13f   :  { %v80_v26 = vadd.f32 %v79_v23, %v78_v20 }
 0x140   :  { %v66_v24 = vrot.slane %v65_v22, 1 }
 0x142   :  { %v67_v25 = vadd.f32 %v66_v24, %v65_v22 }
 0x144   :  { %100 = vpush %v67_v25 }
 0x145   :  { %102 = vpush %v80_v26 }
 0x175   :  { %s101_s0 = spop %100 }
 0x176   :  { %70 = sst [smem:[#allocation7]] %s101_s0  ;;  %s103_s1 = spop %102 }
 0x177   :  { %83 = sst [smem:[#allocation7 + $0x1]] %s103_s1 }
 0x178   :  { %91 = dma.smem_to_hbm %s165_s19, 16, %s192_s2, [#allocation4]  }
 0x179   :  { %160 = dma.done.wait [#allocation4], 16  }
 0x17a   :  { %161 = vsyncadd [#allocation4], 4294967280 }
 0x17b   :  { %95 = sfence }
 0x17c   :  { %96 = vsyncpa [#allocation3], 1 }
 0x17d   :  { %97 = vsyncpa [#allocation6], 1 }
 0x17e   :  { %98 = vsyncpa [#allocation4], 1 }

</bundles_post_ra>
